<compile_context>
chip_gen: v7x
topology: tpu7x:2x2x1
jax: 0.10.0
libtpu: 0.0.40
codegen_flags: <defaults>
</compile_context>

<pallas_src>
import functools

import jax
import jax.numpy as jnp
from jax.experimental import pallas as pl
from jax.experimental.pallas import tpu as pltpu


def _round_up(x, m):
    return (x + m - 1) // m * m


# -----------------------------------------------------------------------------
# Stage 1: normalize + concat + per-row positives / squared norms.
# -----------------------------------------------------------------------------
def _prep_kernel(emb_i_ref, emb_j_ref, r_ref, pos_ref, sq_ref):
    eps2 = 1e-24  # (F.normalize eps = 1e-12) ** 2

    zi = emb_i_ref[...].astype(jnp.float32)
    zj = emb_j_ref[...].astype(jnp.float32)

    si = jnp.sum(zi * zi, axis=1, keepdims=True)
    sj = jnp.sum(zj * zj, axis=1, keepdims=True)
    # x / max(||x||, eps) == x * rsqrt(max(||x||^2, eps^2))  (EUP rsqrt, no div)
    zi = zi * jax.lax.rsqrt(jnp.maximum(si, eps2))
    zj = zj * jax.lax.rsqrt(jnp.maximum(sj, eps2))

    sq_i = jnp.sum(zi * zi, axis=1, keepdims=True)  # ~1.0 (0.0 for all-zero rows)
    sq_j = jnp.sum(zj * zj, axis=1, keepdims=True)
    # positives: -||zi - zj||^2 = 2<zi, zj> - |zi|^2 - |zj|^2 (row-wise, O(N*D))
    pos = 2.0 * jnp.sum(zi * zj, axis=1, keepdims=True) - sq_i - sq_j

    r_ref[...] = jnp.concatenate([zi, zj], axis=0)
    pos_ref[...] = jnp.concatenate([pos, pos], axis=0)
    sq_ref[...] = jnp.concatenate([sq_i, sq_j], axis=0)


# -----------------------------------------------------------------------------
# Stage 2: tiled NT-Xent denominator via streaming log-sum-exp.
# -----------------------------------------------------------------------------
def _ntxent_kernel(pos_ref, sqcol_ref, rrow_ref, rcol_ref, out_ref,
                   m_ref, l_ref, *, rows, inv_t, tm, tn):
    i = pl.program_id(0)
    j = pl.program_id(1)

    @pl.when(j == 0)
    def _init():
        m_ref[...] = jnp.full_like(m_ref, -jnp.inf)
        l_ref[...] = jnp.zeros_like(l_ref)

    rt = rrow_ref[...]                       # (tm, d_pad) f32, L2-normalized
    ct = rcol_ref[...]                       # (tn, d_pad)

    # Gram tile on the MXU; contraction on the last axis of BOTH operands
    # (no r.T -> no XLU transpose, no extra VMEM copy).
    g = jax.lax.dot_general(rt, ct, (((1,), (1,)), ((), ())),
                            preferred_element_type=jnp.float32)   # (tm, tn)

    sq_r = jnp.sum(rt * rt, axis=1, keepdims=True)   # (tm, 1)  natural layout
    sq_c = sqcol_ref[...]                            # (1, tn)  lane-oriented input
    sim = 2.0 * g - sq_r - sq_c                      # -||r_a - r_b||^2

    row_ids = i * tm + jax.lax.broadcasted_iota(jnp.int32, (tm, tn), 0)
    col_ids = j * tn + jax.lax.broadcasted_iota(jnp.int32, (tm, tn), 1)
    # exclude the diagonal (negatives_mask) and zero-padded columns
    invalid = jnp.logical_or(row_ids == col_ids, col_ids >= rows)

    logits = jnp.where(invalid, -jnp.inf, sim * inv_t)   # multiply by 1/T, no div

    # Streaming log-sum-exp over column tiles (flash-attention style).
    m_prev = m_ref[...]
    m_new = jnp.maximum(m_prev, jnp.max(logits, axis=1, keepdims=True))
    alpha = jnp.exp(m_prev - m_new)
    p = jnp.exp(logits - m_new)
    l_ref[...] = alpha * l_ref[...] + jnp.sum(p, axis=1, keepdims=True)
    m_ref[...] = m_new

    @pl.when(j == pl.num_programs(1) - 1)
    def _finalize():
        log_denom = m_ref[...] + jnp.log(l_ref[...])               # (tm, 1)
        # loss_partial = -log(exp(pos/T) / denom) = log(denom) - pos/T
        out_ref[...] = log_denom - pos_ref[...] * inv_t


def contrastive_loss(emb_i, emb_j, temperature=0.1):
    n, d = emb_i.shape
    assert emb_j.shape == (n, d)
    rows = 2 * n
    inv_t = 1.0 / float(temperature)

    # Zero-pad the feature (MXU contraction) dim to a multiple of 128: a no-op
    # for norms and the Gram matrix, restores full lane/MXU utilization.
    d_pad = _round_up(d, 128)
    ei = jnp.pad(emb_i.astype(jnp.float32), ((0, 0), (0, d_pad - d)))
    ej = jnp.pad(emb_j.astype(jnp.float32), ((0, 0), (0, d_pad - d)))

    r, pos, sq = pl.pallas_call(
        _prep_kernel,
        out_shape=(jax.ShapeDtypeStruct((rows, d_pad), jnp.float32),
                   jax.ShapeDtypeStruct((rows, 1), jnp.float32),
                   jax.ShapeDtypeStruct((rows, 1), jnp.float32)),
        in_specs=[pl.BlockSpec((n, d_pad), lambda: (0, 0)),
                  pl.BlockSpec((n, d_pad), lambda: (0, 0))],
        out_specs=(pl.BlockSpec((rows, d_pad), lambda: (0, 0)),
                   pl.BlockSpec((rows, 1), lambda: (0, 0)),
                   pl.BlockSpec((rows, 1), lambda: (0, 0))),
    )(ei, ej)

    # Tile sizes: lane-dense (multiple of 128) column tiles; tm divides tn so a
    # single row padding works for both views.  Working set stays a few MiB.
    if rows >= 1024:
        tn, tm = 512, 256
    else:
        tn, tm = 128, 128
    rows_pad = _round_up(rows, tn)           # divisible by both tm and tn
    pad_r = rows_pad - rows
    r_pad = jnp.pad(r, ((0, pad_r), (0, 0)))
    pos_pad = jnp.pad(pos, ((0, pad_r), (0, 0)))
    sq_col = jnp.pad(sq, ((0, pad_r), (0, 0))).reshape(1, rows_pad)

    grid = (rows_pad // tm, rows_pad // tn)
    kernel = functools.partial(_ntxent_kernel, rows=rows, inv_t=inv_t, tm=tm, tn=tn)
    per_row = pl.pallas_call(
        kernel,
        out_shape=jax.ShapeDtypeStruct((rows_pad, 1), jnp.float32),
        grid_spec=pltpu.PrefetchScalarGridSpec(
            num_scalar_prefetch=0,
            grid=grid,
            in_specs=[
                pl.BlockSpec((tm, 1), lambda i, j: (i, 0)),       # positives
                pl.BlockSpec((1, tn), lambda i, j: (0, j)),       # |r_b|^2 (col view)
                pl.BlockSpec((tm, d_pad), lambda i, j: (i, 0)),   # r row tile
                pl.BlockSpec((tn, d_pad), lambda i, j: (j, 0)),   # r col tile
            ],
            out_specs=pl.BlockSpec((tm, 1), lambda i, j: (i, 0)),
            scratch_shapes=[pltpu.VMEM((tm, 1), jnp.float32),     # running max
                            pltpu.VMEM((tm, 1), jnp.float32)],    # running sum
        ),
        compiler_params=pltpu.CompilerParams(
            dimension_semantics=("parallel", "arbitrary")),
    )(pos_pad, sq_col, r_pad, r_pad)

    # Final scalar reduction (drop padded rows) — trivial wrapper-side plumbing.
    return jnp.sum(per_row[:rows]) / rows


def contrastive_loss_ref(emb_i, emb_j, temperature=0.1):
    """Pure-JAX reference mirroring the PyTorch module (for sanity check)."""
    eps = 1e-12
    zi = emb_i / jnp.maximum(jnp.linalg.norm(emb_i, axis=1, keepdims=True), eps)
    zj = emb_j / jnp.maximum(jnp.linalg.norm(emb_j, axis=1, keepdims=True), eps)
    r = jnp.concatenate([zi, zj], axis=0)
    diff = r[:, None, :] - r[None, :, :]
    sim = -jnp.sum(diff * diff, axis=2)
    n = emb_i.shape[0]
    sim_ij = jnp.diagonal(sim, offset=n)
    sim_ji = jnp.diagonal(sim, offset=-n)
    positives = jnp.concatenate([sim_ij, sim_ji], axis=0)
    neg_mask = 1.0 - jnp.eye(2 * n, dtype=jnp.float32)
    nominator = jnp.exp(positives / temperature)
    denominator = jnp.sum(neg_mask * jnp.exp(sim / temperature), axis=1)
    loss_partial = -jnp.log(nominator / denominator)
    return jnp.sum(loss_partial) / (2 * n)


if __name__ == "__main__":
    key = jax.random.PRNGKey(0)
    k1, k2 = jax.random.split(key)
    batch_size, hidden = 4, 32
    emb_i = jax.random.normal(k1, (batch_size, hidden), dtype=jnp.float32)
    emb_j = jax.random.normal(k2, (batch_size, hidden), dtype=jnp.float32)

    loss = jax.block_until_ready(contrastive_loss(emb_i, emb_j, temperature=0.1))
    ref = jax.block_until_ready(contrastive_loss_ref(emb_i, emb_j, temperature=0.1))

    assert jnp.isfinite(loss), "loss is not finite"
    assert abs(float(loss) - float(ref)) < 1e-3, (float(loss), float(ref))
    print("KERNEL_OK")
</pallas_src>

<mosaic_0001>
module attributes {stable_mosaic.version = 11 : i64} {
  func.func @_prep_kernel(%arg0: memref<4x128xf32, #tpu.memory_space<vmem>>, %arg1: memref<4x128xf32, #tpu.memory_space<vmem>>, %arg2: memref<8x128xf32, #tpu.memory_space<vmem>>, %arg3: memref<8x1xf32, #tpu.memory_space<vmem>>, %arg4: memref<8x1xf32, #tpu.memory_space<vmem>>) attributes {dimension_semantics = [], scalar_prefetch = 0 : i64, scratch_operands = 0 : i64, tpu.core_type = #tpu.core_type<tc>} {
    %c0 = arith.constant 0 : index
    %c0_0 = arith.constant 0 : index
    %0 = vector.load %arg0[%c0, %c0_0] : memref<4x128xf32, #tpu.memory_space<vmem>>, vector<4x128xf32>
    %c0_1 = arith.constant 0 : index
    %c0_2 = arith.constant 0 : index
    %1 = vector.load %arg1[%c0_1, %c0_2] : memref<4x128xf32, #tpu.memory_space<vmem>>, vector<4x128xf32>
    %2 = arith.mulf %0, %0 : vector<4x128xf32>
    %cst = arith.constant dense<0.000000e+00> : vector<4xf32>
    %3 = vector.multi_reduction <add>, %2, %cst [1] : vector<4x128xf32> to vector<4xf32>
    %4 = vector.shape_cast %3 : vector<4xf32> to vector<4x1xf32>
    %5 = arith.mulf %1, %1 : vector<4x128xf32>
    %cst_3 = arith.constant dense<0.000000e+00> : vector<4xf32>
    %6 = vector.multi_reduction <add>, %5, %cst_3 [1] : vector<4x128xf32> to vector<4xf32>
    %7 = vector.shape_cast %6 : vector<4xf32> to vector<4x1xf32>
    %cst_4 = arith.constant 1.000000e-24 : f32
    %8 = vector.broadcast %cst_4 : f32 to vector<4x1xf32>
    %9 = arith.maximumf %4, %8 : vector<4x1xf32>
    %10 = math.rsqrt %9 : vector<4x1xf32>
    %11 = vector.broadcast %10 : vector<4x1xf32> to vector<4x128xf32>
    %12 = arith.mulf %0, %11 : vector<4x128xf32>
    %cst_5 = arith.constant 1.000000e-24 : f32
    %13 = vector.broadcast %cst_5 : f32 to vector<4x1xf32>
    %14 = arith.maximumf %7, %13 : vector<4x1xf32>
    %15 = math.rsqrt %14 : vector<4x1xf32>
    %16 = vector.broadcast %15 : vector<4x1xf32> to vector<4x128xf32>
    %17 = arith.mulf %1, %16 : vector<4x128xf32>
    %18 = arith.mulf %12, %12 : vector<4x128xf32>
    %cst_6 = arith.constant dense<0.000000e+00> : vector<4xf32>
    %19 = vector.multi_reduction <add>, %18, %cst_6 [1] : vector<4x128xf32> to vector<4xf32>
    %20 = vector.shape_cast %19 : vector<4xf32> to vector<4x1xf32>
    %21 = arith.mulf %17, %17 : vector<4x128xf32>
    %cst_7 = arith.constant dense<0.000000e+00> : vector<4xf32>
    %22 = vector.multi_reduction <add>, %21, %cst_7 [1] : vector<4x128xf32> to vector<4xf32>
    %23 = vector.shape_cast %22 : vector<4xf32> to vector<4x1xf32>
    %24 = arith.mulf %12, %17 : vector<4x128xf32>
    %cst_8 = arith.constant dense<0.000000e+00> : vector<4xf32>
    %25 = vector.multi_reduction <add>, %24, %cst_8 [1] : vector<4x128xf32> to vector<4xf32>
    %26 = vector.shape_cast %25 : vector<4xf32> to vector<4x1xf32>
    %cst_9 = arith.constant 2.000000e+00 : f32
    %27 = vector.broadcast %cst_9 : f32 to vector<4x1xf32>
    %28 = arith.mulf %27, %26 : vector<4x1xf32>
    %29 = arith.subf %28, %20 : vector<4x1xf32>
    %30 = arith.subf %29, %23 : vector<4x1xf32>
    %31 = tpu.concatenate %12, %17 in 0 : vector<4x128xf32>, vector<4x128xf32> -> vector<8x128xf32>
    %c0_10 = arith.constant 0 : index
    %c0_11 = arith.constant 0 : index
    %32 = vector.load %arg2[%c0_10, %c0_11] : memref<8x128xf32, #tpu.memory_space<vmem>>, vector<8x128xf32>
    tpu.vector_store %arg2[%c0_10, %c0_11], %31 {strides = array<i32>} : memref<8x128xf32, #tpu.memory_space<vmem>>, vector<8x128xf32>,
    %33 = tpu.concatenate %30, %30 in 0 : vector<4x1xf32>, vector<4x1xf32> -> vector<8x1xf32>
    %c0_12 = arith.constant 0 : index
    %c0_13 = arith.constant 0 : index
    %34 = vector.load %arg3[%c0_12, %c0_13] : memref<8x1xf32, #tpu.memory_space<vmem>>, vector<8x1xf32>
    tpu.vector_store %arg3[%c0_12, %c0_13], %33 {strides = array<i32>} : memref<8x1xf32, #tpu.memory_space<vmem>>, vector<8x1xf32>,
    %35 = tpu.concatenate %20, %23 in 0 : vector<4x1xf32>, vector<4x1xf32> -> vector<8x1xf32>
    %c0_14 = arith.constant 0 : index
    %c0_15 = arith.constant 0 : index
    %36 = vector.load %arg4[%c0_14, %c0_15] : memref<8x1xf32, #tpu.memory_space<vmem>>, vector<8x1xf32>
    tpu.vector_store %arg4[%c0_14, %c0_15], %35 {strides = array<i32>} : memref<8x1xf32, #tpu.memory_space<vmem>>, vector<8x1xf32>,
    return
  }
}

</mosaic_0001>

<bundles_post_ra>
// kernel: tpu_custom_call.1
= control target key start
LH: loop header
LB: loop body
LE: loop exit
PB: predicated region body
PF: predicated region fallthrough
CT: control target
= control target key end

     0   :  { %10 = vsyncpa [#allocation3], 0  ;;  %s268_s0 = inlined_call_operand.hbm [shape: f32[4,128], index: 0, kind: input, shape index: {}]   ;;  %s269_s1 = inlined_call_operand.hbm [shape: f32[4,128], index: 1, kind: input, shape index: {}]   ;;  %s270_s2 = inlined_call_operand.hbm [shape: f32[8,128], index: 2, kind: output, shape index: {0}]   ;;  %s271_s3 = inlined_call_operand.vmem [shape: f32[8,1], index: 3, kind: output, shape index: {1}]   ;;  %s272_s4 = inlined_call_operand.vmem [shape: f32[8,1], index: 4, kind: output, shape index: {2}]  }
   0x1   :  { %11 = vsyncpa [#allocation6], 0 }
   0x2   :  { %12 = vsyncpa [#allocation4], 0  ;;  %s190_s15 = smov [#allocation2]   ;;  %s191_s17 = smov [#allocation5]  }
   0x3   :  { %s19_s16 = sshll.u32 %s190_s15, 4  ;;  %s29_s18 = sshll.u32 %s191_s17, 4  ;;  %s20_s16 = int_to_ptr.vmem [resolvable:$true] %s19_s16  ;;  %s30_s18 = int_to_ptr.vmem [resolvable:$true] %s29_s18 }
   0x4   :  { %s118_s21 = scalar_lea.hbm %s268_s0, 64 }
   0x5   :  { %p119_p0 = scmp.ne.s32.totalorder %s268_s0, %s118_s21  ;;  %p122_p1 = scmp.lt.u32.totalorder %s118_s21, %s268_s0 }
   0x7   :  { %p124_p2 = pnand %p122_p1, %p119_p0 }
   0x9   :  { %127 = shalt.err (!%p124_p2)
}
   0xa   :  { %s128_s26 = scalar_lea.vmem %s20_s16, 64  ;;  %p133_p4 = scmp.lt.s32.totalorder %s20_s16, %s20_s16 }
   0xb   :  { %p129_p3 = scmp.ne.s32.totalorder %s20_s16, %s128_s26  ;;  %p134_p5 = scmp.lt.s32.totalorder %s128_s26, %s128_s26 }
   0xd   :  { %p135_p6 = por %p134_p5, %p133_p4 }
   0xf   :  { %p136_p7 = pnand %p135_p6, %p129_p3 }
  0x11   :  { %139 = shalt.err (!%p136_p7)
}
  0x12   :  { %22 = dma.hbm_to_vmem [thread:$0]  %s268_s0, 64, %s20_s16, [#allocation3]  }
  0x13   :  { %s140_s5 = scalar_lea.hbm %s269_s1, 64 }
  0x14   :  { %p141_p8 = scmp.ne.s32.totalorder %s269_s1, %s140_s5  ;;  %p144_p9 = scmp.lt.u32.totalorder %s140_s5, %s269_s1 }
  0x16   :  { %p146_p10 = pnand %p144_p9, %p141_p8 }
  0x18   :  { %149 = shalt.err (!%p146_p10)
}
  0x19   :  { %s150_s10 = scalar_lea.vmem %s30_s18, 64  ;;  %p155_p12 = scmp.lt.s32.totalorder %s30_s18, %s30_s18 }
  0x1a   :  { %p151_p11 = scmp.ne.s32.totalorder %s30_s18, %s150_s10  ;;  %p156_p13 = scmp.lt.s32.totalorder %s150_s10, %s150_s10 }
  0x1c   :  { %p157_p0 = por %p156_p13, %p155_p12 }
  0x1e   :  { %p158_p1 = pnand %p157_p0, %p151_p11 }
  0x20   :  { %161 = shalt.err (!%p158_p1)
}
  0x21   :  { %32 = dma.hbm_to_vmem [thread:$0]  %s269_s1, 64, %s30_s18, [#allocation6]  }
  0x22   :  { %184 = dma.done.wait [#allocation3], 64  }
  0x23   :  { %185 = vsyncadd [#allocation3], 4294967232 }
  0x24   :  { %186 = dma.done.wait [#allocation6], 64  }
  0x25   :  { %187 = vsyncadd [#allocation6], 4294967232  ;;  %v39_v0 = vld [vmem:[#allocation2] sm:$0xf]  ;;  %vm42_vm0 = vcmask 1043456   ;;  %s192_s1 = smov [#allocation7]  }
  0x26   :  { %v40_v1 = vld [vmem:[#allocation5] sm:$0xf]  ;;  %v41_v2 = vmul.f32 %v39_v0, %v39_v0  ;;  %s93_s12 = sshll.u32 %s192_s1, 4  ;;  %s94_s12 = int_to_ptr.vmem [resolvable:$true] %s93_s12 }
  0x27   :  { %v46_v3 = vmul.f32 %v40_v1, %v40_v1  ;;  %s162_s13 = scalar_lea.vmem %s94_s12, 128  ;;  %p167_p3 = scmp.lt.s32.totalorder %s94_s12, %s94_s12 }
  0x28   :  { %v43_v4 = vsel %vm42_vm0, %v41_v2, 0.0  ;;  %p163_p2 = scmp.ne.s32.totalorder %s94_s12, %s162_s13  ;;  %p168_p4 = scmp.lt.s32.totalorder %s162_s13, %s162_s13 }
  0x29   :  { %44 = vadd.xlane.f32.xlu0 %v43_v4  ;;  %v47_v5 = vsel %vm42_vm0, %v46_v3, 0.0 }
  0x2a   :  { %p169_p5 = por %p168_p4, %p167_p3 }
  0x2c   :  { %p170_p6 = pnand %p169_p5, %p163_p2 }
  0x2d   :  { %48 = vadd.xlane.f32.xlu0 %v47_v5 }
  0xb6   :  { %v45_v6 = vpop.xlane.xlu0 %44 }
  0xb7   :  { %v50_v7 = vmax.f32 %v45_v6, 1e-24 }
  0xb9   :  { %114 = vrsqrt.f32 %v50_v7 }
  0xba   :  { %v49_v8 = vpop.xlane.xlu0 %48 }
  0xbb   :  { %v53_v9 = vmax.f32 %v49_v8, 1e-24 }
  0xbd   :  { %116 = vrsqrt.f32 %v53_v9 }
  0xc3   :  { %v115_v10 = vpop.eup %114 }
  0xc4   :  { %v52_v12 = vmul.f32 %v115_v10, %v39_v0 }
  0xc6   :  { %v56_v19 = vmul.f32 %v52_v12, %v52_v12 }
  0xc7   :  { %v117_v11 = vpop.eup %116 }
  0xc8   :  { %v55_v13 = vmul.f32 %v117_v11, %v40_v1  ;;  %v57_v21 = vsel %vm42_vm0, %v56_v19, 0.0 }
  0xca   :  { %v64_v14 = vmul.f32 %v55_v13, %v52_v12  ;;  %v60_v15 = vmul.f32 %v55_v13, %v55_v13  ;;  %v72_v16 = vrot.slane %v55_v13, 4 }
  0xcc   :  { %v65_v17 = vsel %vm42_vm0, %v64_v14, 0.0  ;;  %v61_v18 = vsel %vm42_vm0, %v60_v15, 0.0  ;;  %v74_v20 = vsel %vm42_vm0, %v52_v12, %v72_v16 }
  0xcd   :  { %66 = vadd.xlane.f32.xlu1 %v65_v17  ;;  %62 = vadd.xlane.f32.xlu0 %v61_v18  ;;  %75 = vst [vmem:[#allocation7] sm:$0xff] %v74_v20 }
  0xd1   :  { %58 = vadd.xlane.f32.xlu1 %v57_v21 }
  0xd2   :  { %173 = shalt.err (!%p170_p6)
}
  0xd3   :  { %s174_s16 = scalar_lea.hbm %s270_s2, 128 }
  0xd4   :  { %p175_p7 = scmp.ne.s32.totalorder %s270_s2, %s174_s16  ;;  %p178_p8 = scmp.lt.u32.totalorder %s174_s16, %s270_s2 }
  0xd6   :  { %p180_p9 = pnand %p178_p8, %p175_p7 }
  0xd8   :  { %183 = shalt.err (!%p180_p9)
}
  0xd9   :  { %96 = dma.vmem_to_hbm [thread:$0]  %s94_s12, 128, %s270_s2, [#allocation4]   ;;  %vm80_vm1 = vcmask 7168  }
 0x15a   :  { %v67_v22 = vpop.xlane.xlu1 %66  ;;  %v63_v23 = vpop.xlane.xlu0 %62 }
 0x15b   :  { %v68_v24 = vmul.f32 2.0, %v67_v22  ;;  %v83_v25 = vrot.slane %v63_v23, 4 }
 0x15e   :  { %v59_v26 = vpop.xlane.xlu1 %58 }
 0x15f   :  { %v69_v27 = vsub.f32 %v68_v24, %v59_v26  ;;  %v85_v28 = vsel %vm42_vm0, %v59_v26, %v83_v25 }
 0x160   :  { %86 = vst.msk [vmem:[%s272_s4] sm:$0xff] %vm80_vm1, %v85_v28 }
 0x161   :  { %v70_v29 = vsub.f32 %v69_v27, %v63_v23 }
 0x163   :  { %v77_v30 = vrot.slane %v70_v29, 4 }
 0x165   :  { %v79_v31 = vsel %vm42_vm0, %v70_v29, %v77_v30 }
 0x166   :  { %81 = vst.msk [vmem:[%s271_s3] sm:$0xff] %vm80_vm1, %v79_v31 }
 0x167   :  { %188 = dma.done.wait [#allocation4], 128  }
 0x168   :  { %189 = vsyncadd [#allocation4], 4294967168 }
 0x169   :  { %108 = vsyncpa [#allocation3], 1 }
 0x16a   :  { %109 = vsyncpa [#allocation6], 1 }
 0x16b   :  { %110 = vsyncpa [#allocation4], 1 }

</bundles_post_ra>
